<compile_context>
chip_gen: v7x
topology: tpu7x:2x2x1
jax: 0.10.0
libtpu: 0.0.40
codegen_flags: <defaults>
</compile_context>

<pallas_src>
import math
import functools

import jax
import jax.numpy as jnp
from jax import lax
from jax.experimental import pallas as pl
from jax.experimental.pallas import tpu as pltpu


def _round_up(x, m):
    return ((x + m - 1) // m) * m


# --------------------------------------------------------------------------
# Fast path: whole table resident in VMEM, gather by in-VMEM row indexing.
# --------------------------------------------------------------------------
def _embedding_vmem_kernel(ids_ref, table_ref, o_ref, *, scale, tok_block):
    """ids_ref: SMEM (n_pad,) int32; table_ref: VMEM (vocab, d_model);
    o_ref: VMEM (tok_block, d_model) output tile."""
    base = pl.program_id(0) * tok_block

    def body(j, carry):
        tid = ids_ref[base + j]                       # scalar id from SMEM
        row = table_ref[pl.ds(tid, 1), :]             # (1, d_model) VMEM load
        o_ref[pl.ds(j, 1), :] = (
            row.astype(jnp.float32) * scale).astype(o_ref.dtype)
        return carry

    lax.fori_loop(0, tok_block, body, 0)


# --------------------------------------------------------------------------
# Large-vocab path: table stays in HBM; DMA rows straight into the output
# tile, then scale in place (no staging buffer).
# --------------------------------------------------------------------------
def _embedding_hbm_kernel(ids_ref, table_hbm, o_ref, sem, *, scale, tok_block):
    """ids_ref: SMEM (n_pad,) int32; table_hbm: HBM (vocab, d_model) raw ref;
    o_ref: VMEM (tok_block, d_model); sem: single shared DMA semaphore."""
    base = pl.program_id(0) * tok_block

    def row_copy(j):
        tid = ids_ref[base + j]
        return pltpu.make_async_copy(
            table_hbm.at[pl.ds(tid, 1), :],   # (1, d_model) row in HBM
            o_ref.at[pl.ds(j, 1), :],         # directly into the output tile
            sem.at[0],
        )

    def issue(j, carry):
        row_copy(j).start()
        return carry

    lax.fori_loop(0, tok_block, issue, 0)

    # All copies are the same size and share one semaphore, so tok_block
    # waits guarantee every row has landed (order of completion irrelevant).
    def wait(j, carry):
        row_copy(j).wait()
        return carry

    lax.fori_loop(0, tok_block, wait, 0)

    # Scale in f32, cast on store (single full-tile pass over o_ref).
    o_ref[...] = (o_ref[...].astype(jnp.float32) * scale).astype(o_ref.dtype)


# ----------------------------------------------------------------- wrapper ---

def pallas_embedding(ids, table, *, tok_block=256, force_hbm=False,
                     vmem_table_bytes=8 * 1024 * 1024):
    """ids: int array of any shape; table: (vocab, d_model).
    Returns lut(ids) * sqrt(d_model) with shape ids.shape + (d_model,)."""
    vocab, d_model = table.shape
    itemsize = jnp.dtype(table.dtype).itemsize
    orig_shape = ids.shape
    scale = math.sqrt(d_model)

    flat = ids.reshape(-1).astype(jnp.int32)
    # Guard: an out-of-range id would be an out-of-bounds HBM DMA (hard fault).
    flat = jnp.clip(flat, 0, vocab - 1)
    n = flat.shape[0]

    # Token block: sublane-aligned for the table dtype (8 rows f32, 16 bf16,
    # 32 int8), no larger than the (rounded-up) token count.
    min_rows = max(8, 32 // itemsize)
    tb = max(min_rows, min(tok_block, _round_up(n, min_rows)))
    tb = _round_up(tb, min_rows)
    n_blocks = -(-n // tb)
    n_pad = n_blocks * tb
    if n_pad != n:
        flat = jnp.concatenate([flat, jnp.zeros((n_pad - n,), jnp.int32)])

    use_vmem_table = (not force_hbm) and (
        vocab * d_model * itemsize <= vmem_table_bytes)

    cost = pl.CostEstimate(
        flops=n_pad * d_model,
        transcendentals=0,
        bytes_accessed=(2 * n_pad * d_model * itemsize + n_pad * 4
                        + (vocab * d_model * itemsize if use_vmem_table else 0)),
    )

    if use_vmem_table:
        kernel = functools.partial(
            _embedding_vmem_kernel, scale=scale, tok_block=tb)
        grid_spec = pltpu.PrefetchScalarGridSpec(
            num_scalar_prefetch=1,                     # flat ids -> SMEM
            grid=(n_blocks,),
            in_specs=[pl.BlockSpec((vocab, d_model),   # table resident in VMEM
                                   lambda i, ids_s: (0, 0))],
            out_specs=pl.BlockSpec((tb, d_model), lambda i, ids_s: (i, 0)),
        )
    else:
        kernel = functools.partial(
            _embedding_hbm_kernel, scale=scale, tok_block=tb)
        grid_spec = pltpu.PrefetchScalarGridSpec(
            num_scalar_prefetch=1,
            grid=(n_blocks,),
            in_specs=[pl.BlockSpec(memory_space=pl.ANY)],  # table stays in HBM
            out_specs=pl.BlockSpec((tb, d_model), lambda i, ids_s: (i, 0)),
            scratch_shapes=[pltpu.SemaphoreType.DMA((1,))],
        )

    out = pl.pallas_call(
        kernel,
        out_shape=jax.ShapeDtypeStruct((n_pad, d_model), table.dtype),
        grid_spec=grid_spec,
        compiler_params=pltpu.CompilerParams(
            dimension_semantics=("parallel",),   # megacore shards token blocks
        ),
        cost_estimate=cost,
    )(flat, table)

    return out[:n].reshape(*orig_shape, d_model)


# -------------------------------------------------------------------- main ---

if __name__ == "__main__":
    B, T, vocab, d_model = 2, 8, 1000, 128

    key = jax.random.PRNGKey(0)
    k_tab, k_ids = jax.random.split(key)

    table = jax.random.normal(k_tab, (vocab, d_model), jnp.float32)
    ids = jax.random.randint(k_ids, (B, T), 0, vocab, dtype=jnp.int32)

    # Reference: lut(x) * sqrt(d_model)
    ref = table[ids] * math.sqrt(d_model)

    # Fast path (table fits in VMEM -> resident-table gather).
    out_fast = jax.block_until_ready(pallas_embedding(ids, table))
    assert out_fast.shape == (B, T, d_model)
    assert jnp.all(jnp.isfinite(out_fast))
    assert jnp.allclose(out_fast, ref, rtol=1e-6, atol=1e-6)

    # Large-vocab path (forced): manual HBM row DMAs straight into the output
    # tile, small token block so the grid actually has >1 step to pipeline.
    out_hbm = jax.block_until_ready(
        pallas_embedding(ids, table, tok_block=8, force_hbm=True))
    assert out_hbm.shape == (B, T, d_model)
    assert jnp.allclose(out_hbm, ref, rtol=1e-6, atol=1e-6)

    print("KERNEL_OK")
</pallas_src>

<mosaic_0001>
module attributes {stable_mosaic.version = 11 : i64} {
  func.func @_embedding_vmem_kernel(%arg0: i32, %arg1: memref<16xi32, #tpu.memory_space<smem>>, %arg2: memref<1000x128xf32, #tpu.memory_space<vmem>>, %arg3: memref<16x128xf32, #tpu.memory_space<vmem>>) attributes {dimension_semantics = [#tpu.dimension_semantics<parallel>], iteration_bounds = array<i64: 1>, scalar_prefetch = 1 : i64, scratch_operands = 0 : i64, tpu.core_type = #tpu.core_type<tc>, window_params = [{pipeline_mode = #tpu.pipeline_mode<synchronous>, transform_indices = @transform_0, window_bounds = array<i64: 1000, 128>}, {transform_indices = @transform_1, window_bounds = array<i64: 16, 128>}]} {
    %c16_i32 = arith.constant 16 : i32
    %0 = arith.muli %arg0, %c16_i32 : i32
    %c0_i32 = arith.constant 0 : i32
    %c16_i32_0 = arith.constant 16 : i32
    %1 = arith.addi %c0_i32, %c16_i32_0 : i32
    %c1_i32 = arith.constant 1 : i32
    scf.for %arg4 = %c0_i32 to %1 step %c1_i32  : i32 {
      %2 = arith.addi %0, %arg4 : i32
      %3 = arith.index_cast %2 : i32 to index
      %4 = memref.load %arg1[%3] : memref<16xi32, #tpu.memory_space<smem>>
      %5 = arith.index_cast %4 : i32 to index
      %c0 = arith.constant 0 : index
      %6 = vector.load %arg2[%5, %c0] : memref<1000x128xf32, #tpu.memory_space<vmem>>, vector<1x128xf32>
      %cst = arith.constant 11.3137083 : f32
      %7 = vector.broadcast %cst : f32 to vector<1x128xf32>
      %8 = arith.mulf %6, %7 : vector<1x128xf32>
      %9 = arith.index_cast %arg4 : i32 to index
      %c0_2 = arith.constant 0 : index
      %10 = vector.load %arg3[%9, %c0_2] : memref<16x128xf32, #tpu.memory_space<vmem>>, vector<1x128xf32>
      tpu.vector_store %arg3[%9, %c0_2], %8 {strides = array<i32>} : memref<16x128xf32, #tpu.memory_space<vmem>>, vector<1x128xf32>,
    }
    %c16_i32_1 = arith.constant 16 : i32
    return
  }
  func.func @transform_0(%arg0: i32, %arg1: memref<16xi32, #tpu.memory_space<smem>>) -> (i32, i32) {
    %c0_i32 = arith.constant 0 : i32
    %c0_i32_0 = arith.constant 0 : i32
    %c0_i32_1 = arith.constant 0 : i32
    return %c0_i32, %c0_i32_0 : i32, i32
  }
  func.func @transform_1(%arg0: i32, %arg1: memref<16xi32, #tpu.memory_space<smem>>) -> (i32, i32) {
    %c0_i32 = arith.constant 0 : i32
    %c0_i32_0 = arith.constant 0 : i32
    return %arg0, %c0_i32 : i32, i32
  }
}

</mosaic_0001>

<bundles_post_ra>
// kernel: tpu_custom_call.1
= control target key start
LH: loop header
LB: loop body
LE: loop exit
PB: predicated region body
PF: predicated region fallthrough
CT: control target
= control target key end

     0   :  { %s209_s0 = inlined_call_operand.hbm [shape: s32[16], index: 0, kind: input, shape index: {}]   ;;  %s210_s1 = inlined_call_operand.hbm [shape: f32[1000,128], index: 1, kind: input, shape index: {}]   ;;  %s211_s2 = inlined_call_operand.hbm [shape: f32[16,128], index: 2, kind: output, shape index: {}]  }
   0x1   :  { %s79_s11 = scalar_lea.hbm %s209_s0, 16 }
   0x2   :  { %p80_p0 = scmp.ne.s32.totalorder %s209_s0, %s79_s11  ;;  %p83_p1 = scmp.lt.u32.totalorder %s79_s11, %s209_s0 }
   0x4   :  { %p85_p2 = pnand %p83_p1, %p80_p0 }
   0x6   :  { %88 = shalt.err (!%p85_p2)  }
   0x7   :  { %s147_s16 = smov [#allocation3]  }
   0x8   :  { %8 = dma.hbm_to_smem %s209_s0, 16, %s147_s16, [#allocation2] }
   0x9   :  { %137 = dma.done.wait [#allocation2], 16 }
   0xa   :  { %138 = vsyncadd [#allocation2], 4294967280 }
   0xb   :  { %10 = sfence }
   0xc   :  { %11 = vsyncpa [#allocation5], 0 }
   0xd   :  { %12 = vsyncpa [#allocation6], 0  ;;  %s148_s19 = smov [#allocation4]   ;;  %s89_s23 = scalar_lea.hbm %s210_s1, 16000 }
   0xe   :  { %s18_s20 = sshll.u32 %s148_s19, 4  ;;  %p90_p3 = scmp.ne.s32.totalorder %s210_s1, %s89_s23  ;;  %s19_s20 = int_to_ptr.vmem [resolvable:$true] %s18_s20 }
   0xf   :  { %p93_p4 = scmp.lt.u32.totalorder %s89_s23, %s210_s1 }
  0x11   :  { %p95_p5 = pnand %p93_p4, %p90_p3 }
  0x13   :  { %98 = shalt.err (!%p95_p5)
}
  0x14   :  { %s99_s0 = scalar_lea.vmem %s19_s20, 16000  ;;  %p104_p7 = scmp.lt.s32.totalorder %s19_s20, %s19_s20 }
  0x15   :  { %p100_p6 = scmp.ne.s32.totalorder %s19_s20, %s99_s0  ;;  %p105_p8 = scmp.lt.s32.totalorder %s99_s0, %s99_s0 }
  0x17   :  { %p106_p9 = por %p105_p8, %p104_p7 }
  0x19   :  { %p107_p10 = pnand %p106_p9, %p100_p6 }
  0x1b   :  { %110 = shalt.err (!%p107_p10)
}
  0x1c   :  { %s149_s28 = smov 128   ;;  %s150_s29 = smov 8  }
  0x1d   :  { %24 = dma.hbm_to_vmem [thread:$0]  %s210_s1, 16000, %s19_s20, [#allocation5], %s149_s28, %s149_s28, %s150_s29  }
  0x1e   :  { %139 = dma.done.wait [#allocation5], 16000  }
  0x1f   :  { %140 = vsyncadd [#allocation5], 4294951296  ;;  %s143_s4 = smov 0  }
  0x20 LB: > { %s36_s5 = sld [smem:[#allocation3 + %s145_s4]]  ;;  %s40_s7 = scalar_lea.vmem [#allocation7], %s145_s4  ;;  %s145_s4 = sphi %s143_s4, %s34_s4  }
  0x21   : > { %s34_s4 = sadd.s32 1, %s145_s4  }
  0x22   : > { %p31_p11 = scmp.ge.s32.totalorder %s34_s4, 16  }
  0x23   :  { %s151_s8 = smov (%p31_p11), [#allocation7]  }
  0x24   :  { %33 = sbr.rel (!%p31_p11) target bundleno = 32 (0x20), region = 37  ;;  %s47_s9 = sshll.u32 (%p31_p11), %s151_s8, 4  ;;  %s48_s9 = int_to_ptr.vmem [resolvable:$true] %s47_s9 }
  0x25   :  { %s111_s1 = scalar_lea.vmem (%p31_p11), %s48_s9, 256  ;;  %p116_p13 = scmp.lt.s32.totalorder (%p31_p11), %s48_s9, %s48_s9 }
  0x26   : > { %s37_s6 = scalar_lea.vmem [#allocation4], %s36_s5  ;;  %p112_p12 = scmp.ne.s32.totalorder (%p31_p11), %s48_s9, %s111_s1 }
  0x27   : > { %v38_v0 = vld [vmem:[%s37_s6] sm:$0x1]  ;;  %p117_p0 = scmp.lt.s32.totalorder (%p31_p11), %s111_s1, %s111_s1 }
  0x28   : > { %v39_v1 = vmul.f32 11.313708, %v38_v0 }
  0x29   :  { %p118_p1 = por (%p31_p11), %p117_p0, %p116_p13 }
  0x2a   : > { %41 = vst [vmem:[%s40_s7] sm:$0x1] %v39_v1 }
  0x2b   :  { %p119_p2 = pnand %p118_p1, %p112_p12 }
  0x2d   :  { %122 = shalt.err (!%p119_p2)
}
  0x2e   :  { %s123_s12 = scalar_lea.hbm %s211_s2, 256 }
  0x2f   :  { %p124_p3 = scmp.ne.s32.totalorder %s211_s2, %s123_s12  ;;  %p127_p4 = scmp.lt.u32.totalorder %s123_s12, %s211_s2 }
  0x31   :  { %p129_p5 = pnand %p127_p4, %p124_p3 }
  0x33   :  { %132 = shalt.err (!%p129_p5)
}
  0x34   :  { %53 = dma.vmem_to_hbm [thread:$0]  %s48_s9, 256, %s211_s2, [#allocation6], %s149_s28, %s149_s28, %s150_s29  }
  0x35   :  { %141 = dma.done.wait [#allocation6], 256  }
  0x36   :  { %142 = vsyncadd [#allocation6], 4294967040 }
  0x37   :  { %57 = vsyncpa [#allocation5], 1 }
  0x38   :  { %58 = vsyncpa [#allocation6], 1 }

</bundles_post_ra>
